<compile_context>
chip_gen: v5e
topology: v5e:2x2
jax: 0.10.0
libtpu: 0.0.40
codegen_flags: <defaults>
</compile_context>

<pallas_src>
import functools

import jax
import jax.numpy as jnp
from jax.experimental import pallas as pl
from jax.experimental.pallas import tpu as pltpu


def _round_up(a: int, b: int) -> int:
    return (a + b - 1) // b * b


# --------------------- Stage 1: node projection (MXU) -----------------------
def _project_kernel(x_ref, w_ref, b_ref, out_ref):
    # out = x @ [W1u | W1v] + [b1 | 0]    -> [TP, 2L]
    out_ref[...] = (
        jnp.dot(x_ref[...], w_ref[...], preferred_element_type=jnp.float32)
        + b_ref[...]
    )


# ---------------- Stage 2: pairwise edge probability per tile ---------------
def _pairwise_edge_kernel(xu_ref, xvT_ref, adj_ref, w1a_ref, w2_ref, b2_ref,
                          out_ref, *, latent_dim: int):
    # xu_ref : [TM, L]  rows of this i-block,  xu = x @ W1u + b1
    # xvT_ref: [L, TN]  cols of this j-block,  xv^T = (x @ W1v)^T
    # adj_ref: [TM, TN] dense adjacency tile (nonzeros = sparse support)
    # w1a_ref: [1, L]   (SMEM)   w2_ref: [1, L] (SMEM)   b2_ref: [1, 1] (SMEM)
    adj = adj_ref[...]
    xu = xu_ref[...]
    xvT = xvT_ref[...]

    # Register-resident accumulator, initialized with the Linear2 bias.
    acc = jnp.zeros_like(adj) + b2_ref[0, 0]

    # Statically unrolled accumulation over the latent dimension: no
    # [TM, TN, L] cube, no cross-lane reduction, one store per tile.
    for l in range(latent_dim):
        pre = xu[:, l:l + 1] + xvT[l:l + 1, :] + adj * w1a_ref[0, l]
        h = jnp.where(pre >= 0.0, pre, 0.01 * pre)      # LeakyReLU(0.01)
        acc = acc + h * w2_ref[0, l]

    # to_dense(): off-support entries are exactly zero; relu keeps them zero.
    # TODO(synk): support is inferred from adj != 0; explicitly-stored zero
    # entries of the original torch.sparse tensor would need a separate mask.
    support = (adj != 0.0).astype(jnp.float32)
    out_ref[...] = jnp.maximum(acc, 0.0) * support


# ------------------------------- wrapper ------------------------------------
def dgg_learnablek_forward(x, in_adj, params, *, block_m=64, block_n=128):
    """Equivalent of DGG_LearnableK.forward(x, in_adj, temp) (live path only)."""
    N, D = x.shape
    L = params["W1u"].shape[1]

    # Tile sizes: rows multiple of 8, cols multiple of 128 (lane-dense output).
    tm = min(block_m, _round_up(N, 8))
    tn = min(block_n, _round_up(N, 128))
    n_r = _round_up(N, tm)        # padded rows  (multiple of tm)
    n_c = _round_up(N, tn)        # padded cols  (multiple of tn, >= 128)

    # ---- Stage 1: xuv = x @ [W1u | W1v] + [b1 | 0], row-tiled --------------
    w_uv = jnp.concatenate([params["W1u"], params["W1v"]], axis=1)       # [D, 2L]
    b_uv = jnp.concatenate(
        [params["b1"], jnp.zeros_like(params["b1"])], axis=1)           # [1, 2L]

    tp = 128
    n_proj = _round_up(max(n_r, n_c), tp)
    x_pad = jnp.pad(x, ((0, n_proj - N), (0, 0)))

    xuv = pl.pallas_call(
        _project_kernel,
        out_shape=jax.ShapeDtypeStruct((n_proj, 2 * L), jnp.float32),
        grid=(n_proj // tp,),
        in_specs=[
            pl.BlockSpec((tp, D), lambda i: (i, 0)),       # x rows
            pl.BlockSpec((D, 2 * L), lambda i: (0, 0)),    # fused W1
            pl.BlockSpec((1, 2 * L), lambda i: (0, 0)),    # fused bias
        ],
        out_specs=pl.BlockSpec((tp, 2 * L), lambda i: (i, 0)),
        compiler_params=pltpu.CompilerParams(
            dimension_semantics=("parallel",)),
    )(x_pad, w_uv, b_uv)

    xu = xuv[:n_r, :L]                    # [n_r, L]  (b1 folded in)
    xvT = jnp.transpose(xuv[:n_c, L:])    # [L, n_c]

    adj_pad = jnp.pad(in_adj, ((0, n_r - N), (0, n_c - N)))

    # ---- Stage 2: pairwise tiles over a 2-D (i, j) grid --------------------
    out = pl.pallas_call(
        functools.partial(_pairwise_edge_kernel, latent_dim=L),
        out_shape=jax.ShapeDtypeStruct((n_r, n_c), jnp.float32),
        grid=(n_r // tm, n_c // tn),
        in_specs=[
            pl.BlockSpec((tm, L), lambda i, j: (i, 0)),            # xu   (rows i)
            pl.BlockSpec((L, tn), lambda i, j: (0, j)),            # xv^T (cols j)
            pl.BlockSpec((tm, tn), lambda i, j: (i, j)),           # adj tile
            pl.BlockSpec(memory_space=pltpu.MemorySpace.SMEM),     # w1a [1, L]
            pl.BlockSpec(memory_space=pltpu.MemorySpace.SMEM),     # w2  [1, L]
            pl.BlockSpec(memory_space=pltpu.MemorySpace.SMEM),     # b2  [1, 1]
        ],
        out_specs=pl.BlockSpec((tm, tn), lambda i, j: (i, j)),
        compiler_params=pltpu.CompilerParams(
            dimension_semantics=("parallel", "parallel")),
    )(xu, xvT, adj_pad, params["w1a"], params["w2"], params["b2"])

    # Slice away padding; unsqueeze(0) to match edge_p.to_dense().unsqueeze(0).
    return out[:N, :N][None]


def reference_forward(x, in_adj, params):
    """Pure-JAX reference mirroring the PyTorch code path."""
    xu = x @ params["W1u"]
    xv = x @ params["W1v"]
    pre = (xu[:, None, :] + xv[None, :, :]
           + in_adj[:, :, None] * params["w1a"][0]
           + params["b1"][0])
    h = jnp.where(pre >= 0, pre, 0.01 * pre)
    z = jnp.sum(h * params["w2"][0], axis=-1) + params["b2"][0, 0]
    mask = (in_adj != 0.0).astype(jnp.float32)
    return (jnp.maximum(z, 0.0) * mask)[None]


if __name__ == "__main__":
    # Small shapes consistent with the module defaults:
    # in_dim=32, adj_dim=1, latent_dim=64; N=16 nodes.
    N, in_dim, latent_dim = 16, 32, 64

    key = jax.random.PRNGKey(0)
    k_x, k_mask, k_val, k1, k2, k3, k4, k5 = jax.random.split(key, 8)

    x = jax.random.normal(k_x, (N, in_dim), dtype=jnp.float32)

    # Dense adjacency whose nonzero entries form the sparse support
    # (stands in for the coalesced torch.sparse in_adj).
    mask = (jax.random.uniform(k_mask, (N, N)) < 0.3).astype(jnp.float32)
    vals = jax.random.uniform(k_val, (N, N), minval=0.1, maxval=1.0,
                              dtype=jnp.float32)
    in_adj = mask * vals

    # Synthetic parameters for input_adj_project:
    #   Linear(2*in_dim + adj_dim, latent_dim) -> LeakyReLU -> Linear(latent_dim, 1)
    # The first Linear's weight is stored split into W1u / W1v / w1a.
    params = dict(
        W1u=0.1 * jax.random.normal(k1, (in_dim, latent_dim), jnp.float32),
        W1v=0.1 * jax.random.normal(k2, (in_dim, latent_dim), jnp.float32),
        w1a=0.1 * jax.random.normal(k3, (1, latent_dim), jnp.float32),
        b1=0.1 * jax.random.normal(k4, (1, latent_dim), jnp.float32),
        w2=0.1 * jax.random.normal(k5, (1, latent_dim), jnp.float32),
        b2=jnp.full((1, 1), 0.05, dtype=jnp.float32),
    )
    # TODO(synk): everything after `return edge_p` in the PyTorch forward
    # (gumbel perturbation, k_estimate_net, select_top_k) is unreachable dead
    # code and is intentionally not implemented.

    out = jax.block_until_ready(dgg_learnablek_forward(x, in_adj, params))
    ref = reference_forward(x, in_adj, params)

    assert out.shape == (1, N, N)
    assert jnp.allclose(out, ref, atol=1e-4, rtol=1e-4)
    print("KERNEL_OK")
</pallas_src>

<mosaic_0001>
module attributes {stable_mosaic.version = 11 : i64} {
  func.func @_project_kernel(%arg0: i32, %arg1: memref<128x32xf32, #tpu.memory_space<vmem>>, %arg2: memref<32x128xf32, #tpu.memory_space<vmem>>, %arg3: memref<1x128xf32, #tpu.memory_space<vmem>>, %arg4: memref<128x128xf32, #tpu.memory_space<vmem>>) attributes {dimension_semantics = [#tpu.dimension_semantics<parallel>], iteration_bounds = array<i64: 1>, scalar_prefetch = 0 : i64, scratch_operands = 0 : i64, tpu.core_type = #tpu.core_type<tc>, window_params = [{transform_indices = @transform_0, window_bounds = array<i64: 128, 32>}, {pipeline_mode = #tpu.pipeline_mode<synchronous>, transform_indices = @transform_1, window_bounds = array<i64: 32, 128>}, {pipeline_mode = #tpu.pipeline_mode<synchronous>, transform_indices = @transform_2, window_bounds = array<i64: 1, 128>}, {transform_indices = @transform_3, window_bounds = array<i64: 128, 128>}]} {
    %c0 = arith.constant 0 : index
    %c0_0 = arith.constant 0 : index
    %0 = vector.load %arg1[%c0, %c0_0] : memref<128x32xf32, #tpu.memory_space<vmem>>, vector<128x32xf32>
    %c0_1 = arith.constant 0 : index
    %c0_2 = arith.constant 0 : index
    %1 = vector.load %arg2[%c0_1, %c0_2] : memref<32x128xf32, #tpu.memory_space<vmem>>, vector<32x128xf32>
    %cst = arith.constant dense<0.000000e+00> : vector<128x128xf32>
    %2 = tpu.matmul %0, %1, %cst {dimension_numbers = #tpu.dot_dimension_numbers<[1], [0], [0], [1], [0, 0, 1, 1], [], []>} : vector<128x32xf32>, vector<32x128xf32>, vector<128x128xf32> -> vector<128x128xf32>
    %c0_3 = arith.constant 0 : index
    %c0_4 = arith.constant 0 : index
    %3 = vector.load %arg3[%c0_3, %c0_4] : memref<1x128xf32, #tpu.memory_space<vmem>>, vector<1x128xf32>
    %4 = vector.broadcast %3 : vector<1x128xf32> to vector<128x128xf32>
    %5 = arith.addf %2, %4 : vector<128x128xf32>
    %c0_5 = arith.constant 0 : index
    %c0_6 = arith.constant 0 : index
    %6 = vector.load %arg4[%c0_5, %c0_6] : memref<128x128xf32, #tpu.memory_space<vmem>>, vector<128x128xf32>
    tpu.vector_store %arg4[%c0_5, %c0_6], %5 {strides = array<i32>} : memref<128x128xf32, #tpu.memory_space<vmem>>, vector<128x128xf32>,
    return
  }
  func.func @transform_0(%arg0: i32) -> (i32, i32) {
    %c0_i32 = arith.constant 0 : i32
    %c0_i32_0 = arith.constant 0 : i32
    return %arg0, %c0_i32 : i32, i32
  }
  func.func @transform_1(%arg0: i32) -> (i32, i32) {
    %c0_i32 = arith.constant 0 : i32
    %c0_i32_0 = arith.constant 0 : i32
    %c0_i32_1 = arith.constant 0 : i32
    return %c0_i32, %c0_i32_0 : i32, i32
  }
  func.func @transform_2(%arg0: i32) -> (i32, i32) {
    %c0_i32 = arith.constant 0 : i32
    %c0_i32_0 = arith.constant 0 : i32
    %c0_i32_1 = arith.constant 0 : i32
    return %c0_i32, %c0_i32_0 : i32, i32
  }
  func.func @transform_3(%arg0: i32) -> (i32, i32) {
    %c0_i32 = arith.constant 0 : i32
    %c0_i32_0 = arith.constant 0 : i32
    return %arg0, %c0_i32 : i32, i32
  }
}

</mosaic_0001>

<bundles_post_ra>
// kernel: tpu_custom_call.1
= control target key start
LH: loop header
LB: loop body
LE: loop exit
PB: predicated region body
PF: predicated region fallthrough
CT: control target
= control target key end

     0   :  { %vm39_vm0 = vcmask 261120   ;;  %s350_s0 = inlined_call_operand.vmem [shape: f32[128,32], index: 0, kind: input, shape index: {}]   ;;  %s351_s1 = inlined_call_operand.vmem [shape: f32[32,128], index: 1, kind: input, shape index: {}]   ;;  %s352_s2 = inlined_call_operand.vmem [shape: f32[1,128], index: 2, kind: input, shape index: {}]   ;;  %s353_s3 = inlined_call_operand.hbm [shape: f32[128,128], index: 3, kind: output, shape index: {}]  }
   0x1   :  { %v34_v0 = vld [vmem:[%s351_s1 + $0x18] sm:$0xff]  ;;  %v33_v1 = vld [vmem:[%s351_s1 + $0x10] sm:$0xff]  ;;  %v32_v2 = vld [vmem:[%s351_s1 + $0x8] sm:$0xff] }
   0x2   :  { %204 = vmatpush.msra.mxu2 %v34_v0  ;;  %205 = vmatpush.msra.mxu3 %v34_v0  ;;  %v31_v3 = vld [vmem:[%s351_s1] sm:$0xff] }
   0x3   :  { %100 = vmatpush.msra.mxu0 %v34_v0  ;;  %203 = vmatpush.msra.mxu1 %v34_v0  ;;  %v23_v4 = vld [vmem:[%s350_s0 + $0x40] sm:$0xff] }
   0x4   :  { %207 = vmatpush.msra.mxu2 %v33_v1  ;;  %208 = vmatpush.msra.mxu3 %v33_v1  ;;  %v27_v5 = vld [vmem:[%s350_s0 + $0x60] sm:$0xff] }
   0x5   :  { %101 = vmatpush.msra.mxu0 %v33_v1  ;;  %206 = vmatpush.msra.mxu1 %v33_v1  ;;  %v15_v6 = vld [vmem:[%s350_s0] sm:$0xff] }
   0x6   :  { %210 = vmatpush.msra.mxu2 %v32_v2  ;;  %211 = vmatpush.msra.mxu3 %v32_v2  ;;  %v19_v7 = vld [vmem:[%s350_s0 + $0x20] sm:$0xff] }
   0x7   :  { %102 = vmatpush.msra.mxu0 %v32_v2  ;;  %209 = vmatpush.msra.mxu1 %v32_v2 }
   0x8   :  { %213 = vmatpush.msra.mxu2 %v31_v3  ;;  %214 = vmatpush.msra.mxu3 %v31_v3 }
   0x9   :  { %8 = vsyncpa [#allocation3], 0  ;;  %195 = vmatmul.msk.f32.vlgmr.msra.gmra.mxu2 %vm39_vm0, %v23_v4  ;;  %199 = vmatmul.msk.f32.vlgmr.msra.gmra.mxu3 %vm39_vm0, %v27_v5  ;;  %v24_v8 = vld [vmem:[%s350_s0 + $0x48] sm:$0xff]  ;;  %v25_v12 = vld [vmem:[%s350_s0 + $0x50] sm:$0xff]  ;;  %s175_s27 = sshll.u32 %s353_s3, 4  ;;  %s246_s28 = smov 128   ;;  %s176_s27 = int_to_ptr.hbm [resolvable:$true] %s175_s27 }
   0xa   :  { %103 = vmatpush.msra.mxu0 %v31_v3  ;;  %212 = vmatpush.msra.mxu1 %v31_v3  ;;  %v28_v9 = vld [vmem:[%s350_s0 + $0x68] sm:$0xff]  ;;  %v29_v13 = vld [vmem:[%s350_s0 + $0x70] sm:$0xff]  ;;  %v26_v16 = vld [vmem:[%s350_s0 + $0x58] sm:$0xff]  ;;  %s247_s29 = smov 8  }
   0xb   :  { %187 = vmatmul.msk.f32.vlgmr.msra.gmra.mxu0 %vm39_vm0, %v15_v6  ;;  %191 = vmatmul.msk.f32.vlgmr.msra.gmra.mxu1 %vm39_vm0, %v19_v7  ;;  %v16_v10 = vld [vmem:[%s350_s0 + $0x8] sm:$0xff]  ;;  %v17_v14 = vld [vmem:[%s350_s0 + $0x10] sm:$0xff]  ;;  %v30_v17 = vld [vmem:[%s350_s0 + $0x78] sm:$0xff] }
   0xc   :  { %v20_v11 = vld [vmem:[%s350_s0 + $0x28] sm:$0xff]  ;;  %v21_v15 = vld [vmem:[%s350_s0 + $0x30] sm:$0xff]  ;;  %v18_v18 = vld [vmem:[%s350_s0 + $0x18] sm:$0xff] }
   0xd   :  { %v22_v19 = vld [vmem:[%s350_s0 + $0x38] sm:$0xff]  ;;  %v218_v20 = vld [vmem:[%s352_s2] ss:$0 sm:$0xff]  ;;  %s245_s0 = smov [#allocation2]  }
   0xe   :  { %s173_s2 = sshll.u32 %s245_s0, 4  ;;  %s174_s2 = int_to_ptr.vmem [resolvable:$true] %s173_s2 }
  0x11   :  { %196 = vmatmul.msk.f32.gmra.mxu2 %vm39_vm0, %v24_v8  ;;  %200 = vmatmul.msk.f32.gmra.mxu3 %vm39_vm0, %v28_v9 }
  0x13   :  { %188 = vmatmul.msk.f32.gmra.mxu0 %vm39_vm0, %v16_v10  ;;  %192 = vmatmul.msk.f32.gmra.mxu1 %vm39_vm0, %v20_v11 }
  0x19   :  { %197 = vmatmul.msk.f32.gmra.mxu2 %vm39_vm0, %v25_v12  ;;  %201 = vmatmul.msk.f32.gmra.mxu3 %vm39_vm0, %v29_v13 }
  0x1b   :  { %189 = vmatmul.msk.f32.gmra.mxu0 %vm39_vm0, %v17_v14  ;;  %193 = vmatmul.msk.f32.gmra.mxu1 %vm39_vm0, %v21_v15 }
  0x21   :  { %198 = vmatmul.msk.f32.gmra.mxu2 %vm39_vm0, %v26_v16  ;;  %202 = vmatmul.msk.f32.gmra.mxu3 %vm39_vm0, %v30_v17 }
  0x23   :  { %190 = vmatmul.msk.f32.gmra.mxu0 %vm39_vm0, %v18_v18  ;;  %194 = vmatmul.msk.f32.gmra.mxu1 %vm39_vm0, %v22_v19 }
  0x88   :  { %v105_v21 = vpop.f32.mrf.mxu0  ;;  %v117_v22 = vpop.f32.mrf.mxu1 }
  0x89   :  { %v106_v23 = vadd.f32 %v218_v20, %v105_v21  ;;  %v118_v24 = vadd.f32 %v218_v20, %v117_v22 }
  0x8b   :  { %153 = vst [vmem:[#allocation2] sm:$0xff] %v106_v23 }
  0x8c   :  { %157 = vst [vmem:[#allocation2 + $0x20] sm:$0xff] %v118_v24  ;;  %v129_v25 = vpop.f32.mrf.mxu2  ;;  %v141_v26 = vpop.f32.mrf.mxu3 }
  0x8d   :  { %v130_v27 = vadd.f32 %v218_v20, %v129_v25  ;;  %v142_v28 = vadd.f32 %v218_v20, %v141_v26 }
  0x8f   :  { %161 = vst [vmem:[#allocation2 + $0x40] sm:$0xff] %v130_v27 }
  0x90   :  { %165 = vst [vmem:[#allocation2 + $0x60] sm:$0xff] %v142_v28  ;;  %v108_v29 = vpop.f32.mrf.mxu0  ;;  %v120_v30 = vpop.f32.mrf.mxu1 }
  0x91   :  { %v109_v31 = vadd.f32 %v218_v20, %v108_v29  ;;  %v121_v32 = vadd.f32 %v218_v20, %v120_v30 }
  0x93   :  { %154 = vst [vmem:[#allocation2 + $0x8] sm:$0xff] %v109_v31 }
  0x94   :  { %158 = vst [vmem:[#allocation2 + $0x28] sm:$0xff] %v121_v32  ;;  %v132_v33 = vpop.f32.mrf.mxu2  ;;  %v144_v34 = vpop.f32.mrf.mxu3 }
  0x95   :  { %v133_v35 = vadd.f32 %v218_v20, %v132_v33  ;;  %v145_v36 = vadd.f32 %v218_v20, %v144_v34 }
  0x97   :  { %162 = vst [vmem:[#allocation2 + $0x48] sm:$0xff] %v133_v35 }
  0x98   :  { %166 = vst [vmem:[#allocation2 + $0x68] sm:$0xff] %v145_v36  ;;  %v111_v37 = vpop.f32.mrf.mxu0  ;;  %v123_v38 = vpop.f32.mrf.mxu1 }
  0x99   :  { %v112_v39 = vadd.f32 %v218_v20, %v111_v37  ;;  %v124_v40 = vadd.f32 %v218_v20, %v123_v38 }
  0x9b   :  { %155 = vst [vmem:[#allocation2 + $0x10] sm:$0xff] %v112_v39 }
  0x9c   :  { %159 = vst [vmem:[#allocation2 + $0x30] sm:$0xff] %v124_v40  ;;  %v135_v41 = vpop.f32.mrf.mxu2  ;;  %v147_v42 = vpop.f32.mrf.mxu3 }
  0x9d   :  { %v136_v43 = vadd.f32 %v218_v20, %v135_v41  ;;  %v148_v44 = vadd.f32 %v218_v20, %v147_v42 }
  0x9f   :  { %163 = vst [vmem:[#allocation2 + $0x50] sm:$0xff] %v136_v43 }
  0xa0   :  { %167 = vst [vmem:[#allocation2 + $0x70] sm:$0xff] %v148_v44  ;;  %v114_v45 = vpop.f32.mrf.mxu0  ;;  %v126_v46 = vpop.f32.mrf.mxu1 }
  0xa1   :  { %v115_v47 = vadd.f32 %v218_v20, %v114_v45  ;;  %v127_v48 = vadd.f32 %v218_v20, %v126_v46 }
  0xa3   :  { %156 = vst [vmem:[#allocation2 + $0x18] sm:$0xff] %v115_v47 }
  0xa4   :  { %160 = vst [vmem:[#allocation2 + $0x38] sm:$0xff] %v127_v48  ;;  %v138_v49 = vpop.f32.mrf.mxu2  ;;  %v150_v50 = vpop.f32.mrf.mxu3 }
  0xa5   :  { %v139_v51 = vadd.f32 %v218_v20, %v138_v49  ;;  %v151_v52 = vadd.f32 %v218_v20, %v150_v50 }
  0xa7   :  { %164 = vst [vmem:[#allocation2 + $0x58] sm:$0xff] %v139_v51 }
  0xa8   :  { %168 = vst [vmem:[#allocation2 + $0x78] sm:$0xff] %v151_v52 }
  0xa9   :  { %181 = dma.vmem_to_hbm [thread:$0]  %s174_s2, 2048, %s176_s27, [#allocation3], %s246_s28, %s246_s28, %s247_s29  }
  0xaa   :  { %243 = dma.done.wait [#allocation3], 2048  }
  0xab   :  { %244 = vsyncadd [#allocation3], 4294965248 }
  0xac   :  { %186 = vsyncpa [#allocation3], 1 }

</bundles_post_ra>
